<compile_context>
chip_gen: v6e
topology: v6e:2x2x1
jax: 0.10.0
libtpu: 0.0.40
codegen_flags: <defaults>
</compile_context>

<pallas_src>
import functools

import jax
import jax.numpy as jnp
from jax import lax
from jax.experimental import pallas as pl
from jax.experimental.pallas import tpu as pltpu


# ----------------------------- config (small) ------------------------------
BATCH = 2
SEQ = 8
HIDDEN = 32
NUM_HEADS = 4
HEAD_DIM = HIDDEN // NUM_HEADS
INTERMEDIATE = 64
LN_EPS = 1e-6
SQRT_2_OVER_PI = 0.7978845608028654  # sqrt(2/pi) for tanh-gelu

VMEM_LIMIT_BYTES = 48 * 1024 * 1024  # above the 32 MiB default scoped limit


def _layer_norm(x, w, b, eps):
    # PyTorch nn.LayerNorm: biased variance over last dim, affine (f32 math).
    mean = jnp.mean(x, axis=-1, keepdims=True)
    var = jnp.mean((x - mean) ** 2, axis=-1, keepdims=True)
    return (x - mean) * lax.rsqrt(var + eps) * w + b


def _gelu_tanh(x):
    # F.gelu(approximate='tanh'), f32 math.
    return 0.5 * x * (1.0 + jnp.tanh(SQRT_2_OVER_PI * (x + 0.044715 * x * x * x)))


# -------------------------- kernel 1: LN1 + QKV -----------------------------
def ln_qkv_kernel(x_ref, ln1w_ref, ln1b_ref, wqkv_ref, bqkv_ref, qkv_ref, *, eps):
    f32 = jnp.float32
    bf16 = jnp.bfloat16
    x = x_ref[...].astype(f32)
    h = _layer_norm(x, ln1w_ref[...].astype(f32), ln1b_ref[...].astype(f32), eps)
    # Fused (D, 3D) QKV projection: bf16 MXU operands, f32 accumulation.
    qkv = jnp.dot(h.astype(bf16), wqkv_ref[...],
                  preferred_element_type=f32) + bqkv_ref[...].astype(f32)
    qkv_ref[...] = qkv.astype(qkv_ref.dtype)


# ------------------- kernel 2: per-(batch, head) attention ------------------
def attention_kernel(q_ref, k_ref, v_ref, o_ref, *, scale):
    f32 = jnp.float32
    bf16 = jnp.bfloat16
    q = q_ref[...].astype(bf16)          # (g, S, hd)
    k = k_ref[...].astype(bf16)
    v = v_ref[...].astype(bf16)
    s = jnp.einsum("gqd,gkd->gqk", q, k, preferred_element_type=f32) * scale
    s = s - jnp.max(s, axis=-1, keepdims=True)
    p = jnp.exp(s)
    # approx reciprocal on the EUP slot; slightly off exact softmax (documented).
    p = p * pl.reciprocal(jnp.sum(p, axis=-1, keepdims=True), approx=True)
    o = jnp.einsum("gqk,gkd->gqd", p.astype(bf16), v, preferred_element_type=f32)
    o_ref[...] = o.astype(o_ref.dtype)


# ------------- kernel 3: out_proj + residual + LN2 + MLP + residual ---------
def out_mlp_kernel(attn_ref, x_ref, wo_ref, bo_ref, ln2w_ref, ln2b_ref,
                   w1_ref, b1_ref, w2_ref, b2_ref, o_ref, *, eps):
    f32 = jnp.float32
    bf16 = jnp.bfloat16
    a = jnp.dot(attn_ref[...].astype(bf16), wo_ref[...],
                preferred_element_type=f32) + bo_ref[...].astype(f32)
    h = x_ref[...].astype(f32) + a
    res = h
    h = _layer_norm(h, ln2w_ref[...].astype(f32), ln2b_ref[...].astype(f32), eps)
    h = jnp.dot(h.astype(bf16), w1_ref[...],
                preferred_element_type=f32) + b1_ref[...].astype(f32)
    h = _gelu_tanh(h)
    h = jnp.dot(h.astype(bf16), w2_ref[...],
                preferred_element_type=f32) + b2_ref[...].astype(f32)
    o_ref[...] = (res + h).astype(o_ref.dtype)


# --------------------------------- wrapper ----------------------------------
def siglip_encoder_layer(x, params, *, num_heads=NUM_HEADS, eps=LN_EPS):
    B, S, D = x.shape
    hd = D // num_heads
    I = params["w1"].shape[1]
    rows = B * S
    x2 = x.reshape(rows, D)

    # Stage weights to bf16 for the MXU (biases / LN params remain f32).
    wqkv = jnp.concatenate(
        [params["wq"], params["wk"], params["wv"]], axis=1).astype(jnp.bfloat16)
    bqkv = jnp.concatenate([params["bq"], params["bk"], params["bv"]], axis=1)
    wo = params["wo"].astype(jnp.bfloat16)
    w1 = params["w1"].astype(jnp.bfloat16)
    w2 = params["w2"].astype(jnp.bfloat16)

    # Row tiling over B*S (weights resident; activations streamed).
    row_tile = rows if rows <= 512 else 512
    assert rows % row_tile == 0, "row count must tile evenly"
    n_row = rows // row_tile

    const2 = lambda i: (0, 0)
    row_params = pltpu.CompilerParams(
        dimension_semantics=("parallel",), vmem_limit_bytes=VMEM_LIMIT_BYTES)

    # ---- kernel 1: LN1 + fused QKV projection ------------------------------
    qkv = pl.pallas_call(
        functools.partial(ln_qkv_kernel, eps=eps),
        out_shape=jax.ShapeDtypeStruct((rows, 3 * D), jnp.float32),
        grid_spec=pltpu.PrefetchScalarGridSpec(
            num_scalar_prefetch=0,
            grid=(n_row,),
            in_specs=[
                pl.BlockSpec((row_tile, D), lambda i: (i, 0)),
                pl.BlockSpec((1, D), const2),
                pl.BlockSpec((1, D), const2),
                pl.BlockSpec((D, 3 * D), const2),
                pl.BlockSpec((1, 3 * D), const2),
            ],
            out_specs=pl.BlockSpec((row_tile, 3 * D), lambda i: (i, 0)),
        ),
        compiler_params=row_params,
        cost_estimate=pl.CostEstimate(
            flops=2 * rows * D * 3 * D,
            transcendentals=rows,
            bytes_accessed=rows * D * 4 + D * 3 * D * 2 + rows * 3 * D * 4),
    )(x2, params["ln1_w"], params["ln1_b"], wqkv, bqkv)

    # Head split in the wrapper (plain XLA reshape/transpose, no in-kernel
    # routing matmuls).  qkv columns are [q | k | v], each head-contiguous.
    qkv3 = (qkv.reshape(B, S, 3, num_heads, hd)
               .transpose(2, 0, 3, 1, 4)
               .reshape(3, B * num_heads, S, hd))
    q, k, v = qkv3[0], qkv3[1], qkv3[2]

    # ---- kernel 2: per-(batch, head) attention ------------------------------
    heads_total = B * num_heads
    g = num_heads                      # heads processed per grid step
    assert heads_total % g == 0
    head_spec = pl.BlockSpec((g, S, hd), lambda i: (i, 0, 0))
    attn = pl.pallas_call(
        functools.partial(attention_kernel, scale=hd ** (-0.5)),
        out_shape=jax.ShapeDtypeStruct((heads_total, S, hd), jnp.float32),
        grid_spec=pltpu.PrefetchScalarGridSpec(
            num_scalar_prefetch=0,
            grid=(heads_total // g,),
            in_specs=[head_spec, head_spec, head_spec],
            out_specs=head_spec,
        ),
        compiler_params=pltpu.CompilerParams(
            dimension_semantics=("parallel",), vmem_limit_bytes=VMEM_LIMIT_BYTES),
        cost_estimate=pl.CostEstimate(
            flops=heads_total * 4 * S * S * hd,
            transcendentals=heads_total * S * S,
            bytes_accessed=4 * heads_total * S * hd * 4),
    )(q, k, v)

    # Head merge back to (B*S, D) row layout (wrapper-side).
    attn2 = (attn.reshape(B, num_heads, S, hd)
                 .transpose(0, 2, 1, 3)
                 .reshape(rows, D))

    # ---- kernel 3: out_proj + residual + LN2 + MLP + residual ---------------
    out = pl.pallas_call(
        functools.partial(out_mlp_kernel, eps=eps),
        out_shape=jax.ShapeDtypeStruct((rows, D), x.dtype),
        grid_spec=pltpu.PrefetchScalarGridSpec(
            num_scalar_prefetch=0,
            grid=(n_row,),
            in_specs=[
                pl.BlockSpec((row_tile, D), lambda i: (i, 0)),   # attn
                pl.BlockSpec((row_tile, D), lambda i: (i, 0)),   # residual x
                pl.BlockSpec((D, D), const2),                    # wo
                pl.BlockSpec((1, D), const2),                    # bo
                pl.BlockSpec((1, D), const2),                    # ln2_w
                pl.BlockSpec((1, D), const2),                    # ln2_b
                pl.BlockSpec((D, I), const2),                    # w1
                pl.BlockSpec((1, I), const2),                    # b1
                pl.BlockSpec((I, D), const2),                    # w2
                pl.BlockSpec((1, D), const2),                    # b2
            ],
            out_specs=pl.BlockSpec((row_tile, D), lambda i: (i, 0)),
        ),
        compiler_params=row_params,
        cost_estimate=pl.CostEstimate(
            flops=2 * rows * (D * D + 2 * D * I),
            transcendentals=rows * (1 + I),
            bytes_accessed=(2 * rows * D * 4 + (D * D + 2 * D * I) * 2
                            + rows * D * 4)),
    )(attn2, x2, wo, params["bo"], params["ln2_w"], params["ln2_b"],
      w1, params["b1"], w2, params["b2"])

    return out.reshape(B, S, D)


# --------------------------- pure-JAX reference -----------------------------
def reference_forward(x, p):
    def ln(h, w, b):
        m = jnp.mean(h, axis=-1, keepdims=True)
        v = jnp.mean((h - m) ** 2, axis=-1, keepdims=True)
        return (h - m) * lax.rsqrt(v + LN_EPS) * w[0] + b[0]

    residual = x
    h = ln(x, p["ln1_w"], p["ln1_b"])
    q = h @ p["wq"] + p["bq"][0]
    k = h @ p["wk"] + p["bk"][0]
    v = h @ p["wv"] + p["bv"][0]
    B, S, D = x.shape

    def split(t):  # (B,S,D) -> (B,H,S,hd)
        return t.reshape(B, S, NUM_HEADS, HEAD_DIM).transpose(0, 2, 1, 3)

    qh, kh, vh = split(q), split(k), split(v)
    s = jnp.einsum("bhqd,bhkd->bhqk", qh, kh) * (HEAD_DIM ** -0.5)
    w = jax.nn.softmax(s.astype(jnp.float32), axis=-1)
    o = jnp.einsum("bhqk,bhkd->bhqd", w, vh)
    o = o.transpose(0, 2, 1, 3).reshape(B, S, D)
    o = o @ p["wo"] + p["bo"][0]
    h = residual + o
    residual = h
    h = ln(h, p["ln2_w"], p["ln2_b"])
    h = h @ p["w1"] + p["b1"][0]
    h = _gelu_tanh(h)
    h = h @ p["w2"] + p["b2"][0]
    return residual + h


def init_params(key):
    ks = jax.random.split(key, 8)
    D, I = HIDDEN, INTERMEDIATE
    std = 0.02
    return {
        "ln1_w": jnp.ones((1, D), jnp.float32),
        "ln1_b": jnp.zeros((1, D), jnp.float32),
        "wq": jax.random.normal(ks[0], (D, D), jnp.float32) * std,
        "bq": jax.random.normal(ks[1], (1, D), jnp.float32) * std,
        "wk": jax.random.normal(ks[2], (D, D), jnp.float32) * std,
        "bk": jnp.zeros((1, D), jnp.float32),
        "wv": jax.random.normal(ks[3], (D, D), jnp.float32) * std,
        "bv": jnp.zeros((1, D), jnp.float32),
        "wo": jax.random.normal(ks[4], (D, D), jnp.float32) * std,
        "bo": jnp.zeros((1, D), jnp.float32),
        "ln2_w": jnp.ones((1, D), jnp.float32),
        "ln2_b": jnp.zeros((1, D), jnp.float32),
        "w1": jax.random.normal(ks[5], (D, I), jnp.float32) * std,
        "b1": jax.random.normal(ks[6], (1, I), jnp.float32) * std,
        "w2": jax.random.normal(ks[7], (I, D), jnp.float32) * std,
        "b2": jnp.zeros((1, D), jnp.float32),
    }


if __name__ == "__main__":
    key = jax.random.PRNGKey(0)
    pkey, xkey = jax.random.split(key)
    params = init_params(pkey)
    x = jax.random.normal(xkey, (BATCH, SEQ, HIDDEN), jnp.float32)

    out = siglip_encoder_layer(x, params)
    out = jax.block_until_ready(out)

    ref = reference_forward(x, params)
    assert out.shape == (BATCH, SEQ, HIDDEN)
    err = jnp.max(jnp.abs(out - ref))
    # Tolerance accounts for bf16 MXU operands (f32 accumulation) and the
    # approximate softmax reciprocal; the reference is pure f32.
    assert jnp.allclose(out, ref, atol=1e-2, rtol=1e-2), f"max abs err {err}"

    print("KERNEL_OK")
</pallas_src>

<mosaic_0001>
module attributes {stable_mosaic.version = 11 : i64} {
  func.func @ln_qkv_kernel(%arg0: i32, %arg1: memref<16x32xf32, #tpu.memory_space<vmem>>, %arg2: memref<1x32xf32, #tpu.memory_space<vmem>>, %arg3: memref<1x32xf32, #tpu.memory_space<vmem>>, %arg4: memref<32x96xbf16, #tpu.memory_space<vmem>>, %arg5: memref<1x96xf32, #tpu.memory_space<vmem>>, %arg6: memref<16x96xf32, #tpu.memory_space<vmem>>) attributes {dimension_semantics = [#tpu.dimension_semantics<parallel>], iteration_bounds = array<i64: 1>, scalar_prefetch = 0 : i64, scratch_operands = 0 : i64, tpu.core_type = #tpu.core_type<tc>, window_params = [{transform_indices = @transform_0, window_bounds = array<i64: 16, 32>}, {pipeline_mode = #tpu.pipeline_mode<synchronous>, transform_indices = @transform_1, window_bounds = array<i64: 1, 32>}, {pipeline_mode = #tpu.pipeline_mode<synchronous>, transform_indices = @transform_2, window_bounds = array<i64: 1, 32>}, {pipeline_mode = #tpu.pipeline_mode<synchronous>, transform_indices = @transform_3, window_bounds = array<i64: 32, 96>}, {pipeline_mode = #tpu.pipeline_mode<synchronous>, transform_indices = @transform_4, window_bounds = array<i64: 1, 96>}, {transform_indices = @transform_5, window_bounds = array<i64: 16, 96>}]} {
    %c0 = arith.constant 0 : index
    %c0_0 = arith.constant 0 : index
    %0 = vector.load %arg1[%c0, %c0_0] : memref<16x32xf32, #tpu.memory_space<vmem>>, vector<16x32xf32>
    %c0_1 = arith.constant 0 : index
    %c0_2 = arith.constant 0 : index
    %1 = vector.load %arg2[%c0_1, %c0_2] : memref<1x32xf32, #tpu.memory_space<vmem>>, vector<1x32xf32>
    %c0_3 = arith.constant 0 : index
    %c0_4 = arith.constant 0 : index
    %2 = vector.load %arg3[%c0_3, %c0_4] : memref<1x32xf32, #tpu.memory_space<vmem>>, vector<1x32xf32>
    %cst = arith.constant dense<0.000000e+00> : vector<16xf32>
    %3 = vector.multi_reduction <add>, %0, %cst [1] : vector<16x32xf32> to vector<16xf32>
    %4 = vector.shape_cast %3 : vector<16xf32> to vector<16x1xf32>
    %cst_5 = arith.constant 3.200000e+01 : f32
    %5 = vector.broadcast %cst_5 : f32 to vector<16x1xf32>
    %6 = arith.divf %4, %5 : vector<16x1xf32>
    %7 = vector.broadcast %6 : vector<16x1xf32> to vector<16x32xf32>
    %8 = arith.subf %0, %7 : vector<16x32xf32>
    %9 = arith.mulf %8, %8 : vector<16x32xf32>
    %cst_6 = arith.constant dense<0.000000e+00> : vector<16xf32>
    %10 = vector.multi_reduction <add>, %9, %cst_6 [1] : vector<16x32xf32> to vector<16xf32>
    %11 = vector.shape_cast %10 : vector<16xf32> to vector<16x1xf32>
    %cst_7 = arith.constant 3.200000e+01 : f32
    %12 = vector.broadcast %cst_7 : f32 to vector<16x1xf32>
    %13 = arith.divf %11, %12 : vector<16x1xf32>
    %14 = vector.broadcast %6 : vector<16x1xf32> to vector<16x32xf32>
    %15 = arith.subf %0, %14 : vector<16x32xf32>
    %cst_8 = arith.constant 9.99999997E-7 : f32
    %16 = vector.broadcast %cst_8 : f32 to vector<16x1xf32>
    %17 = arith.addf %13, %16 : vector<16x1xf32>
    %18 = math.rsqrt %17 : vector<16x1xf32>
    %19 = vector.broadcast %18 : vector<16x1xf32> to vector<16x32xf32>
    %20 = arith.mulf %15, %19 : vector<16x32xf32>
    %21 = vector.broadcast %1 : vector<1x32xf32> to vector<16x32xf32>
    %22 = arith.mulf %20, %21 : vector<16x32xf32>
    %23 = vector.broadcast %2 : vector<1x32xf32> to vector<16x32xf32>
    %24 = arith.addf %22, %23 : vector<16x32xf32>
    %25 = arith.truncf %24 : vector<16x32xf32> to vector<16x32xbf16>
    %c0_9 = arith.constant 0 : index
    %c0_10 = arith.constant 0 : index
    %26 = vector.load %arg4[%c0_9, %c0_10] : memref<32x96xbf16, #tpu.memory_space<vmem>>, vector<32x96xbf16>
    %cst_11 = arith.constant dense<0.000000e+00> : vector<16x96xf32>
    %27 = tpu.matmul %25, %26, %cst_11 {dimension_numbers = #tpu.dot_dimension_numbers<[1], [0], [0], [1], [0, 0, 1, 1], [], []>} : vector<16x32xbf16>, vector<32x96xbf16>, vector<16x96xf32> -> vector<16x96xf32>
    %c0_12 = arith.constant 0 : index
    %c0_13 = arith.constant 0 : index
    %28 = vector.load %arg5[%c0_12, %c0_13] : memref<1x96xf32, #tpu.memory_space<vmem>>, vector<1x96xf32>
    %29 = vector.broadcast %28 : vector<1x96xf32> to vector<16x96xf32>
    %30 = arith.addf %27, %29 : vector<16x96xf32>
    %c0_14 = arith.constant 0 : index
    %c0_15 = arith.constant 0 : index
    %31 = vector.load %arg6[%c0_14, %c0_15] : memref<16x96xf32, #tpu.memory_space<vmem>>, vector<16x96xf32>
    tpu.vector_store %arg6[%c0_14, %c0_15], %30 {strides = array<i32>} : memref<16x96xf32, #tpu.memory_space<vmem>>, vector<16x96xf32>,
    return
  }
  func.func @transform_0(%arg0: i32) -> (i32, i32) {
    %c0_i32 = arith.constant 0 : i32
    %c0_i32_0 = arith.constant 0 : i32
    return %arg0, %c0_i32 : i32, i32
  }
  func.func @transform_1(%arg0: i32) -> (i32, i32) {
    %c0_i32 = arith.constant 0 : i32
    %c0_i32_0 = arith.constant 0 : i32
    %c0_i32_1 = arith.constant 0 : i32
    return %c0_i32, %c0_i32_0 : i32, i32
  }
  func.func @transform_2(%arg0: i32) -> (i32, i32) {
    %c0_i32 = arith.constant 0 : i32
    %c0_i32_0 = arith.constant 0 : i32
    %c0_i32_1 = arith.constant 0 : i32
    return %c0_i32, %c0_i32_0 : i32, i32
  }
  func.func @transform_3(%arg0: i32) -> (i32, i32) {
    %c0_i32 = arith.constant 0 : i32
    %c0_i32_0 = arith.constant 0 : i32
    %c0_i32_1 = arith.constant 0 : i32
    return %c0_i32, %c0_i32_0 : i32, i32
  }
  func.func @transform_4(%arg0: i32) -> (i32, i32) {
    %c0_i32 = arith.constant 0 : i32
    %c0_i32_0 = arith.constant 0 : i32
    %c0_i32_1 = arith.constant 0 : i32
    return %c0_i32, %c0_i32_0 : i32, i32
  }
  func.func @transform_5(%arg0: i32) -> (i32, i32) {
    %c0_i32 = arith.constant 0 : i32
    %c0_i32_0 = arith.constant 0 : i32
    return %arg0, %c0_i32 : i32, i32
  }
}

</mosaic_0001>

<bundles_post_ra>
// kernel: tpu_custom_call.1
= control target key start
LH: loop header
LB: loop body
LE: loop exit
PB: predicated region body
PF: predicated region fallthrough
CT: control target
= control target key end

     0   :  { %10 = vsyncpa [#allocation3], 0  ;;  %s353_s0 = inlined_call_operand.hbm [shape: f32[16,32], index: 0, kind: input, shape index: {}]   ;;  %s354_s1 = inlined_call_operand.vmem [shape: f32[1,32], index: 1, kind: input, shape index: {}]   ;;  %s355_s2 = inlined_call_operand.vmem [shape: f32[1,32], index: 2, kind: input, shape index: {}]   ;;  %s356_s3 = inlined_call_operand.hbm [shape: bf16[32,96], index: 3, kind: input, shape index: {}]   ;;  %s357_s4 = inlined_call_operand.vmem [shape: f32[1,96], index: 4, kind: input, shape index: {}]   ;;  %s358_s5 = inlined_call_operand.hbm [shape: f32[16,96], index: 5, kind: output, shape index: {}]  }
   0x1   :  { %11 = vsyncpa [#allocation6], 0 }
   0x2   :  { %12 = vsyncpa [#allocation4], 0  ;;  %s285_s18 = smov [#allocation2]  }
   0x3   :  { %s18_s19 = sshll.u32 %s285_s18, 4  ;;  %s19_s19 = int_to_ptr.vmem [resolvable:$true] %s18_s19 }
   0x4   :  { %s227_s20 = scalar_lea.vmem %s19_s19, 256  ;;  %p232_p1 = scmp.lt.s32.totalorder %s19_s19, %s19_s19 }
   0x5   :  { %p228_p0 = scmp.ne.s32.totalorder %s19_s19, %s227_s20  ;;  %p233_p2 = scmp.lt.s32.totalorder %s227_s20, %s227_s20 }
   0x7   :  { %p234_p3 = por %p233_p2, %p232_p1 }
   0x9   :  { %p235_p4 = pnand %p234_p3, %p228_p0 }
   0xb   :  { %238 = shalt.err (!%p235_p4)
}
   0xc   :  { %s286_s21 = smov 128   ;;  %s287_s22 = smov 8  }
   0xd   :  { %24 = dma.hbm_to_vmem [thread:$0]  %s353_s0, 256, %s19_s19, [#allocation3], %s286_s21, %s286_s21, %s287_s22  }
   0xe   :  { %s288_s25 = smov [#allocation5]  }
   0xf   :  { %s34_s26 = sshll.u32 %s288_s25, 4  ;;  %s35_s26 = int_to_ptr.vmem [resolvable:$true] %s34_s26 }
  0x10   :  { %s247_s27 = scalar_lea.vmem %s35_s26, 256  ;;  %p252_p6 = scmp.lt.s32.totalorder %s35_s26, %s35_s26 }
  0x11   :  { %p248_p5 = scmp.ne.s32.totalorder %s35_s26, %s247_s27  ;;  %p253_p7 = scmp.lt.s32.totalorder %s247_s27, %s247_s27 }
  0x13   :  { %p254_p8 = por %p253_p7, %p252_p6 }
  0x15   :  { %p255_p9 = pnand %p254_p8, %p248_p5 }
  0x17   :  { %258 = shalt.err (!%p255_p9)
}
  0x18   :  { %s289_s28 = smov 64   ;;  %s290_s29 = smov 4  }
  0x19   :  { %40 = dma.hbm_to_vmem [thread:$0]  %s356_s3, 256, %s35_s26, [#allocation6], %s289_s28, %s289_s28, %s290_s29  }
  0x1a   :  { %279 = dma.done.wait [#allocation3], 256  }
  0x1b   :  { %280 = vsyncadd [#allocation3], 4294967040 }
  0x1c   :  { %281 = dma.done.wait [#allocation6], 256  }
  0x1d   :  { %282 = vsyncadd [#allocation6], 4294967040  ;;  %vm54_vm0 = vcmask 261120   ;;  %v50_v0 = vld [vmem:[#allocation2] sm:$0xff]  ;;  %v51_v1 = vld [vmem:[#allocation2 + $0x8] sm:$0xff]  ;;  %v291_v15 = vmov 0.0  }
  0x1e   :  { %v55_v2 = vsel %vm54_vm0, %v50_v0, 0.0  ;;  %v58_v3 = vsel %vm54_vm0, %v51_v1, 0.0  ;;  %v213_v14 = vld [vmem:[#allocation5 + $0x8] sm:$0xff]   ;;  %196 = vmatprep.subr.bf16.mxu0 %v291_v15  ;;  %vm292_vm1 = vmmov 0   ;;  %v214_v16 = vld [vmem:[#allocation5] sm:$0xff]   ;;  %vm166_vm2 = vcmask 785408  }
  0x1f   :  { %56 = vadd.xlane.f32.xlu0 %v55_v2  ;;  %200 = vmatprep.mubr.msk.bf16.mxu0 %vm292_vm1, %v291_v15  ;;  %v187_v25 = vld [vmem:[%s354_s1] ss:$0 sm:$0xff]  ;;  %s293_s1 = smov [#allocation7]  }
  0x20   :  { %197 = vmatpush3.bf16.msra.mxu0 %v213_v14  ;;  %v188_v29 = vld [vmem:[%s355_s2] ss:$0 sm:$0xff]  ;;  %s174_s11 = sshll.u32 %s293_s1, 4  ;;  %s175_s11 = int_to_ptr.vmem [resolvable:$true] %s174_s11 }
  0x21   :  { %198 = vmatprep.subr.bf16.mxu0 %v291_v15  ;;  %v189_v34 = vld [vmem:[%s357_s4] ss:$0 sm:$0xff]  ;;  %s259_s2 = scalar_lea.vmem %s175_s11, 256  ;;  %p264_p11 = scmp.lt.s32.totalorder %s175_s11, %s175_s11 }
  0x22   :  { %p260_p10 = scmp.ne.s32.totalorder %s175_s11, %s259_s2  ;;  %p265_p12 = scmp.lt.s32.totalorder %s259_s2, %s259_s2 }
  0x23   :  { %59 = vadd.xlane.f32.xlu0 %v58_v3 }
  0x24   :  { %199 = vmatpush3.bf16.msra.mxu0 %v214_v16  ;;  %p266_p13 = por %p265_p12, %p264_p11 }
  0x26   :  { %p267_p0 = pnand %p266_p13, %p260_p10 }
  0xa8   :  { %v57_v4 = vpop.xlane.xlu0 %56 }
  0xa9   :  { %v62_v5 = vmul.f32 0.03125, %v57_v4 }
  0xab   :  { %v64_v6 = vsub.f32 %v50_v0, %v62_v5 }
  0xac   :  { %v60_v7 = vpop.xlane.xlu0 %59 }
  0xad   :  { %v63_v8 = vmul.f32 0.03125, %v60_v7  ;;  %v66_v9 = vmul.f32 %v64_v6, %v64_v6 }
  0xaf   :  { %v65_v10 = vsub.f32 %v51_v1, %v63_v8  ;;  %v68_v11 = vsel %vm54_vm0, %v66_v9, 0.0 }
  0xb0   :  { %69 = vadd.xlane.f32.xlu1 %v68_v11 }
  0xb1   :  { %v67_v12 = vmul.f32 %v65_v10, %v65_v10 }
  0xb3   :  { %v71_v13 = vsel %vm54_vm0, %v67_v12, 0.0 }
  0xb4   :  { %72 = vadd.xlane.f32.xlu1 %v71_v13 }
 0x139   :  { %v70_v17 = vpop.xlane.xlu1 %69 }
 0x13a   :  { %v74_v18 = vmul.f32 0.03125, %v70_v17 }
 0x13c   :  { %v76_v19 = vadd.f32 1e-06, %v74_v18 }
 0x13d   :  { %v73_v20 = vpop.xlane.xlu1 %72 }
 0x13e   :  { %215 = vrsqrt.f32 %v76_v19  ;;  %v75_v21 = vmul.f32 0.03125, %v73_v20 }
 0x140   :  { %v77_v22 = vadd.f32 1e-06, %v75_v21 }
 0x142   :  { %217 = vrsqrt.f32 %v77_v22 }
 0x14b   :  { %v216_v23 = vpop.eup %215 }
 0x14c   :  { %v80_v24 = vmul.f32 %v216_v23, %v64_v6 }
 0x14e   :  { %v88_v28 = vmul.f32 %v187_v25, %v80_v24 }
 0x14f   :  { %v218_v26 = vpop.eup %217 }
 0x150   :  { %v81_v27 = vmul.f32 %v218_v26, %v65_v10  ;;  %v96_v31 = vadd.f32 %v188_v29, %v88_v28 }
 0x152   :  { %v89_v30 = vmul.f32 %v187_v25, %v81_v27 }
 0x154   :  { %v97_v32 = vadd.f32 %v188_v29, %v89_v30 }
 0x156   :  { %v98_v33 = vpack.c.bf16 %v97_v32, %v96_v31 }
 0x158   :  { %201 = vmatmul.mubr.msk.bf16.vlgmr.msra.gmra.mxu0 %vm54_vm0, %v98_v33 }
 0x218   :  { %v159_v35 = vpop.f32.mrf.mxu0 }
 0x219   :  { %v160_v36 = vadd.f32 %v189_v34, %v159_v35 }
 0x21a   :  { %v202_v37 = vpop.f32.mrf.mxu0 }
 0x21b   :  { %167 = vst.msk [vmem:[#allocation7] sm:$0xff] %vm166_vm2, %v160_v36 }
 0x21c   :  { %v162_v38 = vpop.f32.mrf.mxu0 }
 0x21d   :  { %v163_v39 = vadd.f32 %v189_v34, %v162_v38 }
 0x21e   :  { %v203_v40 = vpop.f32.mrf.mxu0 }
 0x21f   :  { %168 = vst.msk [vmem:[#allocation7 + $0x8] sm:$0xff] %vm166_vm2, %v163_v39 }
 0x220   :  { %270 = shalt.err (!%p267_p0)
}
 0x221   :  { %180 = dma.vmem_to_hbm [thread:$0]  %s175_s11, 256, %s358_s5, [#allocation4], %s286_s21, %s286_s21, %s287_s22  }
 0x222   :  { %283 = dma.done.wait [#allocation4], 256  }
 0x223   :  { %284 = vsyncadd [#allocation4], 4294967040 }
 0x224   :  { %184 = vsyncpa [#allocation3], 1 }
 0x225   :  { %185 = vsyncpa [#allocation6], 1 }
 0x226   :  { %186 = vsyncpa [#allocation4], 1 }

</bundles_post_ra>
